<compile_context>
chip_gen: v7x
topology: tpu7x:2x2x1
jax: 0.10.0
libtpu: 0.0.40
codegen_flags: <defaults>
</compile_context>

<pallas_src>
import jax
import jax.numpy as jnp
from jax import lax
from jax.experimental import pallas as pl
from jax.experimental.pallas import tpu as pltpu


_LANES = 128


def _num_row_shards():
    """2 on 2-TensorCore chips (v7x-class), else 1."""
    try:
        kind = jax.devices()[0].device_kind.lower()
    except Exception:
        return 1
    return 2 if "7" in kind else 1


def edge_loss(prediction, label):
    """Pallas implementation of edgeLoss.forward(prediction, label) -> scalar."""
    n = int(prediction.size)
    C = _LANES
    rows = pl.cdiv(n, C)
    pad_elems = rows * C - n

    pred_flat = prediction.reshape(-1)
    lab_flat = label.reshape(-1)
    if pad_elems:
        # Only hit when numel % 128 != 0 (rare for NCHW feature maps).  The pad
        # value is irrelevant: padded elements are masked out inside the kernel.
        pred_flat = jnp.pad(pred_flat, (0, pad_elems))
        lab_flat = jnp.pad(lab_flat, (0, pad_elems))
    pred2d = pred_flat.reshape(rows, C)
    lab2d = lab_flat.reshape(rows, C)

    # --- static tiling -------------------------------------------------------
    CH_MAX, BR_MAX = 512, 8192
    target = min(BR_MAX, rows)
    CH = min(CH_MAX, ((target + 7) // 8) * 8)   # sub-chunk rows (multiple of 8)
    NC = pl.cdiv(target, CH)                    # sub-chunks per row block
    BR = NC * CH                                # rows per grid block
    NBT = pl.cdiv(rows, BR)                     # row blocks actually needed
    P = min(_num_row_shards(), NBT)             # megacore shards
    NB = pl.cdiv(NBT, P)                        # inner ("arbitrary") steps/shard
    # Blocks with index < clean_blocks lie fully inside the n valid elements and
    # take a mask-free fast path; later blocks mask by global element index.
    clean_blocks = n // (BR * C)

    def fold(a):  # (CH,128) -> (8,128): pure vreg adds (VPU only)
        return jnp.sum(a.reshape(CH // 8, 8, C), axis=0)

    label_is_float = jnp.issubdtype(lab2d.dtype, jnp.floating)

    def _terms(x_raw, lab_raw, valid):
        """Per-element positive mask and unreduced BCE-with-logits."""
        x = x_raw.astype(jnp.float32)            # prediction.float()
        zf = lab_raw.astype(jnp.float32)
        if valid is not None:
            # Sanitize BEFORE the exp/log and the int conversion so padded
            # (potentially garbage) lanes can never produce NaN/Inf.
            x = jnp.where(valid, x, 0.0)
            zf = jnp.where(valid, zf, 0.0)
        # label.long(): truncation toward zero for float labels.
        z = zf.astype(jnp.int32).astype(jnp.float32) if label_is_float else zf
        m = (z != 0.0).astype(jnp.float32)
        # Numerically stable binary_cross_entropy_with_logits (no reduction).
        bce = jnp.maximum(x, 0.0) - x * z + jnp.log1p(jnp.exp(-jnp.abs(x)))
        if valid is not None:
            bce = jnp.where(valid, bce, 0.0)
        return m, bce

    def kernel(pred_ref, lab_ref, pos_ref, bpos_ref, bce_ref):
        p = pl.program_id(0)
        i = pl.program_id(1)
        blk = p * NB + i                 # logical row-block index (unclamped)
        blk_row0 = blk * BR

        @pl.when(i == 0)
        def _():
            pos_ref[...] = jnp.zeros_like(pos_ref)
            bpos_ref[...] = jnp.zeros_like(bpos_ref)
            bce_ref[...] = jnp.zeros_like(bce_ref)

        zeros = jnp.zeros((8, C), jnp.float32)

        def run(masked):
            def chunk(c, carry):
                pos_a, bpos_a, bce_a = carry
                r0 = pl.multiple_of(c * CH, CH)
                xt = pred_ref[pl.ds(r0, CH), :]
                lt = lab_ref[pl.ds(r0, CH), :]
                if masked:
                    row = lax.broadcasted_iota(jnp.int32, (CH, C), 0) + (blk_row0 + r0)
                    lane = lax.broadcasted_iota(jnp.int32, (CH, C), 1)
                    valid = row * C + lane < n
                else:
                    valid = None
                m, bce = _terms(xt, lt, valid)
                return (pos_a + fold(m),
                        bpos_a + fold(m * bce),
                        bce_a + fold(bce))

            pos_a, bpos_a, bce_a = lax.fori_loop(0, NC, chunk, (zeros, zeros, zeros))
            pos_ref[...] += pos_a
            bpos_ref[...] += bpos_a
            bce_ref[...] += bce_a

        if clean_blocks >= P * NB:       # everything divides evenly: never mask
            run(masked=False)
        elif clean_blocks == 0:          # tiny input: always mask
            run(masked=True)
        else:
            is_clean = blk < clean_blocks

            @pl.when(is_clean)
            def _():
                run(masked=False)

            @pl.when(jnp.logical_not(is_clean))
            def _():
                run(masked=True)

    # Clamp the block index so shard steps that fall past the end of the array
    # re-read the final block instead of issuing an out-of-range DMA; the
    # in-kernel element mask zeroes their contribution.
    def in_map(p, i):
        return (jnp.minimum(p * NB + i, NBT - 1), 0)

    acc_spec = pl.BlockSpec((8, C), lambda p, i: (p, 0))
    acc_shape = jax.ShapeDtypeStruct((P * 8, C), jnp.float32)

    pos_v, bpos_v, bce_v = pl.pallas_call(
        kernel,
        out_shape=(acc_shape, acc_shape, acc_shape),
        grid_spec=pltpu.PrefetchScalarGridSpec(
            num_scalar_prefetch=0,
            grid=(P, NB),
            in_specs=[
                pl.BlockSpec((BR, C), in_map),
                pl.BlockSpec((BR, C), in_map),
            ],
            out_specs=(acc_spec, acc_spec, acc_spec),
        ),
        compiler_params=pltpu.CompilerParams(
            dimension_semantics=("parallel", "arbitrary"),
            vmem_limit_bytes=32 * 1024 * 1024,
        ),
    )(pred2d, lab2d)

    # Final tiny reductions + scalar class-balance weighting in plain JAX.
    num_positive = jnp.sum(pos_v)
    bpos = jnp.sum(bpos_v)                 # sum of bce where label != 0
    bneg = jnp.sum(bce_v) - bpos           # sum of bce where label == 0
    total = jnp.float32(n)
    num_negative = total - num_positive
    return (num_negative / total) * bpos + (num_positive / total) * bneg


def _edge_loss_ref(prediction, label):
    """Plain-JAX reference mirroring the PyTorch module exactly."""
    lab_long = label.astype(jnp.int32)
    mask = (lab_long != 0).astype(jnp.float32)
    num_positive = jnp.sum(mask)
    num_negative = mask.size - num_positive
    total = jnp.float32(mask.size)
    weight = jnp.where(mask != 0, num_negative / total, num_positive / total)
    x = prediction.astype(jnp.float32)
    z = lab_long.astype(jnp.float32)
    bce = jnp.maximum(x, 0.0) - x * z + jnp.log1p(jnp.exp(-jnp.abs(x)))
    return jnp.sum(weight * bce)


if __name__ == "__main__":
    key = jax.random.PRNGKey(0)
    k1, k2 = jax.random.split(key)

    B, Cc, H, W = 2, 4, 16, 16
    prediction = jax.random.normal(k1, (B, Cc, H, W), dtype=jnp.float32)
    # Binary edge label map (mostly zeros, some ones), like an edge-detection GT.
    label = (jax.random.uniform(k2, (B, Cc, H, W)) > 0.8).astype(jnp.float32)

    out = jax.block_until_ready(edge_loss(prediction, label))
    ref = jax.block_until_ready(_edge_loss_ref(prediction, label))
    assert jnp.allclose(out, ref, rtol=1e-4, atol=1e-5), (out, ref)

    print("KERNEL_OK")
</pallas_src>

<mosaic_0001>
module attributes {stable_mosaic.version = 11 : i64} {
  func.func @kernel(%arg0: i32, %arg1: i32, %arg2: memref<16x128xf32, #tpu.memory_space<vmem>>, %arg3: memref<16x128xf32, #tpu.memory_space<vmem>>, %arg4: memref<8x128xf32, #tpu.memory_space<vmem>>, %arg5: memref<8x128xf32, #tpu.memory_space<vmem>>, %arg6: memref<8x128xf32, #tpu.memory_space<vmem>>) attributes {dimension_semantics = [#tpu.dimension_semantics<parallel>, #tpu.dimension_semantics<arbitrary>], iteration_bounds = array<i64: 1, 1>, scalar_prefetch = 0 : i64, scratch_operands = 0 : i64, tpu.core_type = #tpu.core_type<tc>, window_params = [{transform_indices = @transform_0, window_bounds = array<i64: 16, 128>}, {transform_indices = @transform_1, window_bounds = array<i64: 16, 128>}, {transform_indices = @transform_2, window_bounds = array<i64: 8, 128>}, {transform_indices = @transform_3, window_bounds = array<i64: 8, 128>}, {transform_indices = @transform_4, window_bounds = array<i64: 8, 128>}]} {
    %c0_i32 = arith.constant 0 : i32
    %0 = arith.cmpi eq, %arg1, %c0_i32 : i32
    %1 = arith.extui %0 : i1 to i32
    %c0_i32_0 = arith.constant 0 : i32
    %2 = arith.cmpi ne, %1, %c0_i32_0 : i32
    scf.if %2 {
      %cst_21 = arith.constant 0.000000e+00 : f32
      %45 = vector.broadcast %cst_21 : f32 to vector<8x128xf32>
      %c0_22 = arith.constant 0 : index
      %c0_23 = arith.constant 0 : index
      %46 = vector.load %arg4[%c0_22, %c0_23] : memref<8x128xf32, #tpu.memory_space<vmem>>, vector<8x128xf32>
      tpu.vector_store %arg4[%c0_22, %c0_23], %45 {strides = array<i32>} : memref<8x128xf32, #tpu.memory_space<vmem>>, vector<8x128xf32>,
      %cst_24 = arith.constant 0.000000e+00 : f32
      %47 = vector.broadcast %cst_24 : f32 to vector<8x128xf32>
      %c0_25 = arith.constant 0 : index
      %c0_26 = arith.constant 0 : index
      %48 = vector.load %arg5[%c0_25, %c0_26] : memref<8x128xf32, #tpu.memory_space<vmem>>, vector<8x128xf32>
      tpu.vector_store %arg5[%c0_25, %c0_26], %47 {strides = array<i32>} : memref<8x128xf32, #tpu.memory_space<vmem>>, vector<8x128xf32>,
      %cst_27 = arith.constant 0.000000e+00 : f32
      %49 = vector.broadcast %cst_27 : f32 to vector<8x128xf32>
      %c0_28 = arith.constant 0 : index
      %c0_29 = arith.constant 0 : index
      %50 = vector.load %arg6[%c0_28, %c0_29] : memref<8x128xf32, #tpu.memory_space<vmem>>, vector<8x128xf32>
      tpu.vector_store %arg6[%c0_28, %c0_29], %49 {strides = array<i32>} : memref<8x128xf32, #tpu.memory_space<vmem>>, vector<8x128xf32>,
    } else {
    }
    %cst = arith.constant 0.000000e+00 : f32
    %3 = vector.broadcast %cst : f32 to vector<8x128xf32>
    %c0_i32_1 = arith.constant 0 : i32
    %c16_i32 = arith.constant 16 : i32
    %4 = arith.muli %c0_i32_1, %c16_i32 : i32
    %5 = tpu.assume_multiple %4, 16 : i32
    %6 = arith.index_cast %5 : i32 to index
    %c0 = arith.constant 0 : index
    %7 = vector.load %arg2[%6, %c0] : memref<16x128xf32, #tpu.memory_space<vmem>>, vector<16x128xf32>
    %8 = arith.index_cast %5 : i32 to index
    %c0_2 = arith.constant 0 : index
    %9 = vector.load %arg3[%8, %c0_2] : memref<16x128xf32, #tpu.memory_space<vmem>>, vector<16x128xf32>
    %10 = arith.fptosi %9 : vector<16x128xf32> to vector<16x128xi32>
    %11 = arith.sitofp %10 : vector<16x128xi32> to vector<16x128xf32>
    %cst_3 = arith.constant 0.000000e+00 : f32
    %12 = vector.broadcast %cst_3 : f32 to vector<16x128xf32>
    %13 = arith.cmpf one, %11, %12 : vector<16x128xf32>
    %14 = arith.extui %13 : vector<16x128xi1> to vector<16x128xi32>
    %15 = arith.sitofp %14 : vector<16x128xi32> to vector<16x128xf32>
    %cst_4 = arith.constant 0.000000e+00 : f32
    %16 = vector.broadcast %cst_4 : f32 to vector<16x128xf32>
    %17 = arith.maximumf %7, %16 : vector<16x128xf32>
    %18 = arith.mulf %7, %11 : vector<16x128xf32>
    %19 = arith.subf %17, %18 : vector<16x128xf32>
    %20 = math.absf %7 : vector<16x128xf32>
    %cst_5 = arith.constant 0.000000e+00 : f32
    %21 = vector.broadcast %cst_5 : f32 to vector<16x128xf32>
    %22 = arith.subf %21, %20 : vector<16x128xf32>
    %23 = math.exp %22 : vector<16x128xf32>
    %24 = math.log1p %23 : vector<16x128xf32>
    %25 = arith.addf %19, %24 : vector<16x128xf32>
    %26 = vector.shape_cast %15 : vector<16x128xf32> to vector<2x8x128xf32>
    %cst_6 = arith.constant dense<0.000000e+00> : vector<8x128xf32>
    %27 = vector.multi_reduction <add>, %26, %cst_6 [0] : vector<2x8x128xf32> to vector<8x128xf32>
    %28 = arith.addf %3, %27 : vector<8x128xf32>
    %29 = arith.mulf %15, %25 : vector<16x128xf32>
    %30 = vector.shape_cast %29 : vector<16x128xf32> to vector<2x8x128xf32>
    %cst_7 = arith.constant dense<0.000000e+00> : vector<8x128xf32>
    %31 = vector.multi_reduction <add>, %30, %cst_7 [0] : vector<2x8x128xf32> to vector<8x128xf32>
    %32 = arith.addf %3, %31 : vector<8x128xf32>
    %33 = vector.shape_cast %25 : vector<16x128xf32> to vector<2x8x128xf32>
    %cst_8 = arith.constant dense<0.000000e+00> : vector<8x128xf32>
    %34 = vector.multi_reduction <add>, %33, %cst_8 [0] : vector<2x8x128xf32> to vector<8x128xf32>
    %35 = arith.addf %3, %34 : vector<8x128xf32>
    %c1_i32 = arith.constant 1 : i32
    %c0_9 = arith.constant 0 : index
    %c0_10 = arith.constant 0 : index
    %36 = vector.load %arg4[%c0_9, %c0_10] : memref<8x128xf32, #tpu.memory_space<vmem>>, vector<8x128xf32>
    %37 = arith.addf %36, %28 : vector<8x128xf32>
    %c0_11 = arith.constant 0 : index
    %c0_12 = arith.constant 0 : index
    %38 = vector.load %arg4[%c0_11, %c0_12] : memref<8x128xf32, #tpu.memory_space<vmem>>, vector<8x128xf32>
    tpu.vector_store %arg4[%c0_11, %c0_12], %37 {strides = array<i32>} : memref<8x128xf32, #tpu.memory_space<vmem>>, vector<8x128xf32>,
    %c0_13 = arith.constant 0 : index
    %c0_14 = arith.constant 0 : index
    %39 = vector.load %arg5[%c0_13, %c0_14] : memref<8x128xf32, #tpu.memory_space<vmem>>, vector<8x128xf32>
    %40 = arith.addf %39, %32 : vector<8x128xf32>
    %c0_15 = arith.constant 0 : index
    %c0_16 = arith.constant 0 : index
    %41 = vector.load %arg5[%c0_15, %c0_16] : memref<8x128xf32, #tpu.memory_space<vmem>>, vector<8x128xf32>
    tpu.vector_store %arg5[%c0_15, %c0_16], %40 {strides = array<i32>} : memref<8x128xf32, #tpu.memory_space<vmem>>, vector<8x128xf32>,
    %c0_17 = arith.constant 0 : index
    %c0_18 = arith.constant 0 : index
    %42 = vector.load %arg6[%c0_17, %c0_18] : memref<8x128xf32, #tpu.memory_space<vmem>>, vector<8x128xf32>
    %43 = arith.addf %42, %35 : vector<8x128xf32>
    %c0_19 = arith.constant 0 : index
    %c0_20 = arith.constant 0 : index
    %44 = vector.load %arg6[%c0_19, %c0_20] : memref<8x128xf32, #tpu.memory_space<vmem>>, vector<8x128xf32>
    tpu.vector_store %arg6[%c0_19, %c0_20], %43 {strides = array<i32>} : memref<8x128xf32, #tpu.memory_space<vmem>>, vector<8x128xf32>,
    return
  }
  func.func @transform_0(%arg0: i32, %arg1: i32) -> (i32, i32) {
    %c1_i32 = arith.constant 1 : i32
    %0 = arith.muli %arg0, %c1_i32 : i32
    %1 = arith.addi %0, %arg1 : i32
    %c0_i32 = arith.constant 0 : i32
    %2 = arith.minsi %1, %c0_i32 : i32
    %c0_i32_0 = arith.constant 0 : i32
    %c0_i32_1 = arith.constant 0 : i32
    return %2, %c0_i32_0 : i32, i32
  }
  func.func @transform_1(%arg0: i32, %arg1: i32) -> (i32, i32) {
    %c1_i32 = arith.constant 1 : i32
    %0 = arith.muli %arg0, %c1_i32 : i32
    %1 = arith.addi %0, %arg1 : i32
    %c0_i32 = arith.constant 0 : i32
    %2 = arith.minsi %1, %c0_i32 : i32
    %c0_i32_0 = arith.constant 0 : i32
    %c0_i32_1 = arith.constant 0 : i32
    return %2, %c0_i32_0 : i32, i32
  }
  func.func @transform_2(%arg0: i32, %arg1: i32) -> (i32, i32) {
    %c0_i32 = arith.constant 0 : i32
    %c0_i32_0 = arith.constant 0 : i32
    return %arg0, %c0_i32 : i32, i32
  }
  func.func @transform_3(%arg0: i32, %arg1: i32) -> (i32, i32) {
    %c0_i32 = arith.constant 0 : i32
    %c0_i32_0 = arith.constant 0 : i32
    return %arg0, %c0_i32 : i32, i32
  }
  func.func @transform_4(%arg0: i32, %arg1: i32) -> (i32, i32) {
    %c0_i32 = arith.constant 0 : i32
    %c0_i32_0 = arith.constant 0 : i32
    return %arg0, %c0_i32 : i32, i32
  }
}

</mosaic_0001>

<bundles_post_ra>
// kernel: tpu_custom_call.1
= control target key start
LH: loop header
LB: loop body
LE: loop exit
PB: predicated region body
PF: predicated region fallthrough
CT: control target
= control target key end

     0   :  { %10 = vsyncpa [#allocation3], 0  ;;  %s421_s0 = inlined_call_operand.hbm [shape: f32[16,128], index: 0, kind: input, shape index: {}]   ;;  %s422_s1 = inlined_call_operand.hbm [shape: f32[16,128], index: 1, kind: input, shape index: {}]   ;;  %s423_s2 = inlined_call_operand.hbm [shape: f32[8,128], index: 2, kind: output, shape index: {0}]   ;;  %s424_s3 = inlined_call_operand.hbm [shape: f32[8,128], index: 3, kind: output, shape index: {1}]   ;;  %s425_s4 = inlined_call_operand.hbm [shape: f32[8,128], index: 4, kind: output, shape index: {2}]  }
   0x1   :  { %11 = vsyncpa [#allocation6], 0 }
   0x2   :  { %12 = vsyncpa [#allocation4], 0 }
   0x3   :  { %13 = vsyncpa [#allocation9], 0  ;;  %s323_s15 = smov [#allocation2]   ;;  %s205_s19 = scalar_lea.hbm %s421_s0, 256 }
   0x4   :  { %s25_s16 = sshll.u32 %s323_s15, 4  ;;  %p206_p0 = scmp.ne.s32.totalorder %s421_s0, %s205_s19  ;;  %s26_s16 = int_to_ptr.vmem [resolvable:$true] %s25_s16 }
   0x5   :  { %p209_p1 = scmp.lt.u32.totalorder %s205_s19, %s421_s0 }
   0x7   :  { %p211_p2 = pnand %p209_p1, %p206_p0 }
   0x9   :  { %214 = shalt.err (!%p211_p2)
}
   0xa   :  { %s215_s24 = scalar_lea.vmem %s26_s16, 256  ;;  %p220_p4 = scmp.lt.s32.totalorder %s26_s16, %s26_s16 }
   0xb   :  { %p216_p3 = scmp.ne.s32.totalorder %s26_s16, %s215_s24  ;;  %p221_p5 = scmp.lt.s32.totalorder %s215_s24, %s215_s24 }
   0xd   :  { %p222_p6 = por %p221_p5, %p220_p4 }
   0xf   :  { %p223_p7 = pnand %p222_p6, %p216_p3 }
  0x11   :  { %226 = shalt.err (!%p223_p7)
}
  0x12   :  { %s324_s25 = smov 128   ;;  %s325_s26 = smov 8  }
  0x13   :  { %31 = dma.hbm_to_vmem [thread:$0]  %s421_s0, 256, %s26_s16, [#allocation3], %s324_s25, %s324_s25, %s325_s26  }
  0x14   :  { %s326_s29 = smov [#allocation5]   ;;  %s227_s7 = scalar_lea.hbm %s422_s1, 256 }
  0x15   :  { %s43_s30 = sshll.u32 %s326_s29, 4  ;;  %p228_p8 = scmp.ne.s32.totalorder %s422_s1, %s227_s7  ;;  %s44_s30 = int_to_ptr.vmem [resolvable:$true] %s43_s30 }
  0x16   :  { %p231_p9 = scmp.lt.u32.totalorder %s227_s7, %s422_s1 }
  0x18   :  { %p233_p10 = pnand %p231_p9, %p228_p8 }
  0x1a   :  { %236 = shalt.err (!%p233_p10)
}
  0x1b   :  { %s237_s12 = scalar_lea.vmem %s44_s30, 256  ;;  %p242_p12 = scmp.lt.s32.totalorder %s44_s30, %s44_s30 }
  0x1c   :  { %p238_p11 = scmp.ne.s32.totalorder %s44_s30, %s237_s12  ;;  %p243_p13 = scmp.lt.s32.totalorder %s237_s12, %s237_s12 }
  0x1e   :  { %p244_p0 = por %p243_p13, %p242_p12 }
  0x20   :  { %p245_p1 = pnand %p244_p0, %p238_p11 }
  0x22   :  { %248 = shalt.err (!%p245_p1)
}
  0x23   :  { %49 = dma.hbm_to_vmem [thread:$0]  %s422_s1, 256, %s44_s30, [#allocation6], %s324_s25, %s324_s25, %s325_s26  }
  0x24   :  { %315 = dma.done.wait [#allocation3], 256  }
  0x25   :  { %316 = vsyncadd [#allocation3], 4294967040 }
  0x26   :  { %317 = dma.done.wait [#allocation6], 256  }
  0x27   :  { %318 = vsyncadd [#allocation6], 4294967040  ;;  %v71_v0 = vld [vmem:[#allocation2] sm:$0xff]  ;;  %v380_v1 = vld [vmem:[#allocation2 + $0x8] sm:$0xff]  ;;  %v327_v16 = vmov 0.0   ;;  %s328_s1 = smov [#allocation7]  }
  0x28   :  { %v73_v2 = vld [vmem:[#allocation5] sm:$0xff]  ;;  %v74_v3 = vld [vmem:[#allocation5 + $0x8] sm:$0xff]  ;;  %v91_v5 = vand.u32 2147483647, %v71_v0  ;;  %v92_v7 = vand.u32 2147483647, %v380_v1 }
  0x29   :  { %v185_v4 = vtrunc.f32 %v73_v2  ;;  %v187_v6 = vtrunc.f32 %v74_v3  ;;  %s142_s14 = sshll.u32 %s328_s1, 4  ;;  %s143_s14 = int_to_ptr.vmem [resolvable:$true] %s142_s14 }
  0x2a   :  { %v93_v9 = vsub.f32 0.0, %v91_v5  ;;  %v94_v11 = vsub.f32 0.0, %v92_v7  ;;  %s249_s15 = scalar_lea.vmem %s143_s14, 128  ;;  %p254_p3 = scmp.lt.s32.totalorder %s143_s14, %s143_s14 }
  0x2b   :  { %v186_v8 = vcvt.f32.s32 %v185_v4  ;;  %v188_v10 = vcvt.f32.s32 %v187_v6  ;;  %p250_p2 = scmp.ne.s32.totalorder %s143_s14, %s249_s15  ;;  %p255_p4 = scmp.lt.s32.totalorder %s249_s15, %s249_s15 }
  0x2c   :  { %v95_v13 = vmul.f32 1.442695, %v93_v9  ;;  %v97_v15 = vmul.f32 1.442695, %v94_v11 }
  0x2d   :  { %v77_v12 = vcvt.s32.f32 %v186_v8  ;;  %v78_v14 = vcvt.s32.f32 %v188_v10  ;;  %p256_p5 = por %p255_p4, %p254_p3 }
  0x2e   :  { %197 = vpow2.f32 %v95_v13 }
  0x2f   :  { %vm79_vm0 = vcmp.ne.f32.partialorder %v77_v12, 0.0  ;;  %vm80_vm1 = vcmp.ne.f32.partialorder %v78_v14, 0.0  ;;  %199 = vpow2.f32 %v97_v15  ;;  %p257_p6 = pnand %p256_p5, %p250_p2 }
  0x30   :  { %v183_v17 = vsel %vm79_vm0, 1.0, %v327_v16  ;;  %v184_v18 = vsel %vm80_vm1, 1.0, %v327_v16 }
  0x31   :  { %v119_v19 = vadd.f32 %v184_v18, %v183_v17 }
  0x33   :  { %129 = vst [vmem:[#allocation7] sm:$0xff] %v119_v19 }
  0x34   :  { %260 = shalt.err (!%p257_p6)
}
  0x35   :  { %s261_s18 = scalar_lea.hbm %s423_s2, 128 }
  0x36   :  { %p262_p7 = scmp.ne.s32.totalorder %s423_s2, %s261_s18  ;;  %p265_p8 = scmp.lt.u32.totalorder %s261_s18, %s423_s2 }
  0x38   :  { %p267_p9 = pnand %p265_p8, %p262_p7 }
  0x3a   :  { %270 = shalt.err (!%p267_p9)
}
  0x3b   :  { %145 = dma.vmem_to_hbm [thread:$0]  %s143_s14, 128, %s423_s2, [#allocation4]   ;;  %v198_v20 = vpop.eup %197  ;;  %v85_v27 = vmax.f32 %v71_v0, 0.0  ;;  %v87_v28 = vmul.f32 %v77_v12, %v71_v0  ;;  %v86_v31 = vmax.f32 %v380_v1, 0.0  ;;  %v88_v32 = vmul.f32 %v78_v14, %v380_v1 }
  0x3c   :  { %v200_v21 = vpop.eup %199  ;;  %v99_v22 = vadd.f32 1.0, %v198_v20  ;;  %v102_v24 = vmul.f32 -0.5, %v198_v20  ;;  %v105_v29 = vand.u32 2147483647, %v198_v20  ;;  %s329_s2 = smov [#allocation8]   ;;  %s330_s26 = smov [#allocation10]  }
  0x3d   :  { %v108_v23 = vadd.f32 1.0, %v200_v21  ;;  %v111_v25 = vmul.f32 -0.5, %v200_v21  ;;  %v114_v33 = vand.u32 2147483647, %v200_v21  ;;  %v89_v36 = vsub.f32 %v85_v27, %v87_v28  ;;  %s152_s25 = sshll.u32 %s329_s2, 4  ;;  %s162_s27 = sshll.u32 %s330_s26, 4  ;;  %s153_s25 = int_to_ptr.vmem [resolvable:$true] %s152_s25  ;;  %s163_s27 = int_to_ptr.vmem [resolvable:$true] %s162_s27 }
  0x3e   :  { %201 = vlog2.f32 %v99_v22  ;;  %v103_v26 = vadd.f32 1.0, %v102_v24  ;;  %vm106_vm2 = vcmp.lt.f32.partialorder %v105_v29, 0.0004427343  ;;  %v90_v39 = vsub.f32 %v86_v31, %v88_v32  ;;  %s271_s28 = scalar_lea.vmem %s153_s25, 128  ;;  %p276_p11 = scmp.lt.s32.totalorder %s153_s25, %s153_s25 }
  0x3f   :  { %203 = vlog2.f32 %v108_v23  ;;  %v112_v30 = vadd.f32 1.0, %v111_v25  ;;  %vm115_vm3 = vcmp.lt.f32.partialorder %v114_v33, 0.0004427343  ;;  %p272_p10 = scmp.ne.s32.totalorder %s153_s25, %s271_s28  ;;  %p277_p12 = scmp.lt.s32.totalorder %s271_s28, %s271_s28 }
  0x40   :  { %v104_v34 = vmul.f32 %v198_v20, %v103_v26 }
  0x41   :  { %v113_v37 = vmul.f32 %v200_v21, %v112_v30  ;;  %p278_p13 = por %p277_p12, %p276_p11 }
  0x43   :  { %p279_p0 = pnand %p278_p13, %p272_p10 }
  0x48   :  { %v202_v35 = vpop.eup %201 }
  0x49   :  { %v204_v38 = vpop.eup %203  ;;  %v101_v40 = vmul.f32 0.6931472, %v202_v35 }
  0x4a   :  { %v110_v41 = vmul.f32 0.6931472, %v204_v38 }
  0x4b   :  { %v107_v42 = vsel %vm106_vm2, %v104_v34, %v101_v40 }
  0x4c   :  { %v116_v43 = vsel %vm115_vm3, %v113_v37, %v110_v41  ;;  %v117_v44 = vadd.f32 %v107_v42, %v89_v36 }
  0x4d   :  { %v118_v45 = vadd.f32 %v116_v43, %v90_v39 }
  0x4e   :  { %v121_v46 = vmul.f32 %v183_v17, %v117_v44 }
  0x4f   :  { %v122_v47 = vmul.f32 %v184_v18, %v118_v45  ;;  %v125_v48 = vadd.f32 %v118_v45, %v117_v44 }
  0x51   :  { %v123_v49 = vadd.f32 %v122_v47, %v121_v46  ;;  %135 = vst [vmem:[#allocation10] sm:$0xff] %v125_v48 }
  0x53   :  { %132 = vst [vmem:[#allocation8] sm:$0xff] %v123_v49 }
  0x54   :  { %282 = shalt.err (!%p279_p0)
}
  0x55   :  { %s283_s5 = scalar_lea.hbm %s424_s3, 128 }
  0x56   :  { %p284_p1 = scmp.ne.s32.totalorder %s424_s3, %s283_s5  ;;  %p287_p2 = scmp.lt.u32.totalorder %s283_s5, %s424_s3 }
  0x58   :  { %p289_p3 = pnand %p287_p2, %p284_p1 }
  0x5a   :  { %292 = shalt.err (!%p289_p3)
}
  0x5b   :  { %155 = dma.vmem_to_hbm [thread:$0]  %s153_s25, 128, %s424_s3, [#allocation9]  }
  0x5c   :  { %s293_s12 = scalar_lea.vmem %s163_s27, 128  ;;  %p298_p5 = scmp.lt.s32.totalorder %s163_s27, %s163_s27 }
  0x5d   :  { %p294_p4 = scmp.ne.s32.totalorder %s163_s27, %s293_s12  ;;  %p299_p6 = scmp.lt.s32.totalorder %s293_s12, %s293_s12 }
  0x5f   :  { %p300_p7 = por %p299_p6, %p298_p5 }
  0x61   :  { %p301_p8 = pnand %p300_p7, %p294_p4 }
  0x63   :  { %304 = shalt.err (!%p301_p8)
}
  0x64   :  { %s305_s1 = scalar_lea.hbm %s425_s4, 128 }
  0x65   :  { %p306_p9 = scmp.ne.s32.totalorder %s425_s4, %s305_s1  ;;  %p309_p10 = scmp.lt.u32.totalorder %s305_s1, %s425_s4 }
  0x67   :  { %p311_p11 = pnand %p309_p10, %p306_p9 }
  0x69   :  { %314 = shalt.err (!%p311_p11)
}
  0x6a   :  { %165 = dma.vmem_to_hbm [thread:$0]  %s163_s27, 128, %s425_s4, [#allocation9]  }
  0x6b   :  { %319 = dma.done.wait [#allocation4], 128  }
  0x6c   :  { %320 = vsyncadd [#allocation4], 4294967168 }
  0x6d   :  { %321 = dma.done.wait [#allocation9], 256  }
  0x6e   :  { %322 = vsyncadd [#allocation9], 4294967040 }
  0x6f   :  { %175 = vsyncpa [#allocation3], 1 }
  0x70   :  { %176 = vsyncpa [#allocation6], 1 }
  0x71   :  { %177 = vsyncpa [#allocation4], 1 }
  0x72   :  { %178 = vsyncpa [#allocation9], 1 }

</bundles_post_ra>
